<compile_context>
chip_gen: v6e
topology: v6e:2x2x1
jax: 0.10.0
libtpu: 0.0.40
codegen_flags: <defaults>
</compile_context>

<pallas_src>
import jax
import jax.numpy as jnp
from jax.experimental import pallas as pl
from jax.experimental.pallas import tpu as pltpu

DIM_IN = 768
NUM_CLASSES = 20
N_PAD = 128        # lane-dense padded class dim: unmasked vst, full MXU tile
MAX_TB = 1024      # rows per grid step cap (~7.5 MiB VMEM double-buffered)


def _round_up(x, m):
    return ((x + m - 1) // m) * m


def _cdiv(a, b):
    return (a + b - 1) // b


def _pick_tb(batch):
    """Batch-tile rows: multiple of 16, <= MAX_TB, >= 2 grid steps when the
    batch is big enough (so both v7x TensorCores get work), rebalanced so the
    last partial tile wastes at most one sublane-group worth of rows."""
    if batch <= 16:
        return batch                       # single full-batch tile
    tb = min(MAX_TB, _round_up(batch, 16))
    if _cdiv(batch, tb) < 2:
        tb = _round_up(_cdiv(batch, 2), 16)
    n_tiles = _cdiv(batch, tb)
    return _round_up(_cdiv(batch, n_tiles), 16)


def head_kernel(x_ref, w_ref, b_ref, o_ref):
    # (TB, D) activations cast to bf16 in-register; (D, 128) bf16 weights;
    # f32 MXU accumulation; bias added in f32.
    x_bf = x_ref[...].astype(jnp.bfloat16)
    logits = jnp.dot(x_bf, w_ref[...], preferred_element_type=jnp.float32)
    o_ref[...] = (logits + b_ref[...]).astype(o_ref.dtype)
    # NOTE: rows of a partial last batch tile beyond B hold unspecified data;
    #       Pallas masks their writeback, so the (B, 128) output never sees them.
    # TODO(synk): eval-mode softmax (self.act) intentionally omitted; the
    #             freshly-constructed module is in training mode -> raw logits.


def prepare_params(w, b):
    """One-time (init-time) param prep: pad classes 20 -> 128 with zero
    columns/lanes, cast weight to bf16. Keeps the per-forward path free of
    pad/cast HBM round-trips."""
    w_p = jnp.zeros((DIM_IN, N_PAD), jnp.bfloat16).at[:, :NUM_CLASSES].set(
        w.astype(jnp.bfloat16))
    b_p = jnp.zeros((1, N_PAD), jnp.float32).at[0, :NUM_CLASSES].set(
        b.astype(jnp.float32))
    return w_p, b_p


@jax.jit
def transformer_basic_head(x, w_p, b_p):
    """x: (B, 768) f32 (or bf16); w_p: (768, 128) bf16; b_p: (1, 128) f32.
    Returns (B, 20) f32 logits."""
    B, D = x.shape
    TB = _pick_tb(B)
    grid = (_cdiv(B, TB),)

    flops = 2 * B * D * N_PAD
    bytes_accessed = (x.size * x.dtype.itemsize      # activations read
                      + w_p.size * 2 + b_p.size * 4  # params read once
                      + B * N_PAD * 4)               # padded logits written

    out_padded = pl.pallas_call(
        head_kernel,
        out_shape=jax.ShapeDtypeStruct((B, N_PAD), jnp.float32),
        grid_spec=pltpu.PrefetchScalarGridSpec(
            num_scalar_prefetch=0,
            grid=grid,
            in_specs=[
                pl.BlockSpec((TB, D), lambda i: (i, 0)),     # x: tiled over batch
                pl.BlockSpec((D, N_PAD), lambda i: (0, 0)),  # weights: one block
                pl.BlockSpec((1, N_PAD), lambda i: (0, 0)),  # bias: one block
            ],
            out_specs=pl.BlockSpec((TB, N_PAD), lambda i: (i, 0)),
        ),
        compiler_params=pltpu.CompilerParams(
            dimension_semantics=("parallel",),
        ),
        cost_estimate=pl.CostEstimate(
            flops=flops, transcendentals=0, bytes_accessed=bytes_accessed),
    )(x, w_p, b_p)

    # Only the lane slice is needed: the output array has exactly B rows.
    return out_padded[:, :NUM_CLASSES]


def init_params(key):
    """Deterministic init mimicking nn.Linear's default uniform init."""
    kw, kb = jax.random.split(key)
    bound = 1.0 / jnp.sqrt(float(DIM_IN))
    # PyTorch stores weight as (out, in); we keep it as (in, out) for the kernel.
    w = jax.random.uniform(kw, (DIM_IN, NUM_CLASSES), jnp.float32, -bound, bound)
    b = jax.random.uniform(kb, (NUM_CLASSES,), jnp.float32, -bound, bound)
    return w, b


if __name__ == "__main__":
    key = jax.random.PRNGKey(0)
    kx, kp = jax.random.split(key)

    batch = 8
    x = jax.random.normal(kx, (batch, DIM_IN), jnp.float32)
    w, b = init_params(kp)
    w_p, b_p = prepare_params(w, b)     # once, at "init" time

    out = transformer_basic_head(x, w_p, b_p)
    out = jax.block_until_ready(out)

    # Reference computed with the same bf16-cast operands (f32 accumulation).
    x_bf = x.astype(jnp.bfloat16).astype(jnp.float32)
    w_bf = w.astype(jnp.bfloat16).astype(jnp.float32)
    ref_bf = x_bf @ w_bf + b
    ref_f32 = x @ w + b

    assert out.shape == (batch, NUM_CLASSES)
    assert jnp.allclose(out, ref_bf, atol=1e-2, rtol=1e-2)
    assert jnp.allclose(out, ref_f32, atol=5e-2, rtol=5e-2)

    print("KERNEL_OK")
</pallas_src>

<mosaic_0001>
module attributes {stable_mosaic.version = 11 : i64} {
  func.func @head_kernel(%arg0: i32, %arg1: memref<8x768xf32, #tpu.memory_space<vmem>>, %arg2: memref<768x128xbf16, #tpu.memory_space<vmem>>, %arg3: memref<1x128xf32, #tpu.memory_space<vmem>>, %arg4: memref<8x128xf32, #tpu.memory_space<vmem>>) attributes {dimension_semantics = [#tpu.dimension_semantics<parallel>], iteration_bounds = array<i64: 1>, scalar_prefetch = 0 : i64, scratch_operands = 0 : i64, tpu.core_type = #tpu.core_type<tc>, window_params = [{transform_indices = @transform_0, window_bounds = array<i64: 8, 768>}, {pipeline_mode = #tpu.pipeline_mode<synchronous>, transform_indices = @transform_1, window_bounds = array<i64: 768, 128>}, {pipeline_mode = #tpu.pipeline_mode<synchronous>, transform_indices = @transform_2, window_bounds = array<i64: 1, 128>}, {transform_indices = @transform_3, window_bounds = array<i64: 8, 128>}]} {
    %c0 = arith.constant 0 : index
    %c0_0 = arith.constant 0 : index
    %0 = vector.load %arg1[%c0, %c0_0] : memref<8x768xf32, #tpu.memory_space<vmem>>, vector<8x768xf32>
    %1 = arith.truncf %0 : vector<8x768xf32> to vector<8x768xbf16>
    %c0_1 = arith.constant 0 : index
    %c0_2 = arith.constant 0 : index
    %2 = vector.load %arg2[%c0_1, %c0_2] : memref<768x128xbf16, #tpu.memory_space<vmem>>, vector<768x128xbf16>
    %cst = arith.constant dense<0.000000e+00> : vector<8x128xf32>
    %3 = tpu.matmul %1, %2, %cst {dimension_numbers = #tpu.dot_dimension_numbers<[1], [0], [0], [1], [0, 0, 1, 1], [], []>} : vector<8x768xbf16>, vector<768x128xbf16>, vector<8x128xf32> -> vector<8x128xf32>
    %c0_3 = arith.constant 0 : index
    %c0_4 = arith.constant 0 : index
    %4 = vector.load %arg3[%c0_3, %c0_4] : memref<1x128xf32, #tpu.memory_space<vmem>>, vector<1x128xf32>
    %5 = vector.broadcast %4 : vector<1x128xf32> to vector<8x128xf32>
    %6 = arith.addf %3, %5 : vector<8x128xf32>
    %c0_5 = arith.constant 0 : index
    %c0_6 = arith.constant 0 : index
    %7 = vector.load %arg4[%c0_5, %c0_6] : memref<8x128xf32, #tpu.memory_space<vmem>>, vector<8x128xf32>
    tpu.vector_store %arg4[%c0_5, %c0_6], %6 {strides = array<i32>} : memref<8x128xf32, #tpu.memory_space<vmem>>, vector<8x128xf32>,
    return
  }
  func.func @transform_0(%arg0: i32) -> (i32, i32) {
    %c0_i32 = arith.constant 0 : i32
    %c0_i32_0 = arith.constant 0 : i32
    return %arg0, %c0_i32 : i32, i32
  }
  func.func @transform_1(%arg0: i32) -> (i32, i32) {
    %c0_i32 = arith.constant 0 : i32
    %c0_i32_0 = arith.constant 0 : i32
    %c0_i32_1 = arith.constant 0 : i32
    return %c0_i32, %c0_i32_0 : i32, i32
  }
  func.func @transform_2(%arg0: i32) -> (i32, i32) {
    %c0_i32 = arith.constant 0 : i32
    %c0_i32_0 = arith.constant 0 : i32
    %c0_i32_1 = arith.constant 0 : i32
    return %c0_i32, %c0_i32_0 : i32, i32
  }
  func.func @transform_3(%arg0: i32) -> (i32, i32) {
    %c0_i32 = arith.constant 0 : i32
    %c0_i32_0 = arith.constant 0 : i32
    return %arg0, %c0_i32 : i32, i32
  }
}

</mosaic_0001>

<bundles_post_ra>
// kernel: transformer_basic_head.1
= control target key start
LH: loop header
LB: loop body
LE: loop exit
PB: predicated region body
PF: predicated region fallthrough
CT: control target
= control target key end

     0   :  { %8 = vsyncpa [#allocation3], 0  ;;  %s853_s0 = inlined_call_operand.hbm [shape: f32[8,768], index: 0, kind: input, shape index: {}]   ;;  %s854_s1 = inlined_call_operand.hbm [shape: bf16[768,128], index: 1, kind: input, shape index: {}]   ;;  %s855_s2 = inlined_call_operand.vmem [shape: f32[1,128], index: 2, kind: input, shape index: {}]   ;;  %s856_s3 = inlined_call_operand.hbm [shape: f32[8,128], index: 3, kind: output, shape index: {}]  }
   0x1   :  { %9 = vsyncpa [#allocation6], 0 }
   0x2   :  { %10 = vsyncpa [#allocation4], 0  ;;  %s816_s12 = smov [#allocation2]   ;;  %s817_s14 = smov [#allocation5]  }
   0x3   :  { %s17_s13 = sshll.u32 %s816_s12, 4  ;;  %s26_s15 = sshll.u32 %s817_s14, 4  ;;  %s18_s13 = int_to_ptr.vmem [resolvable:$true] %s17_s13  ;;  %s27_s15 = int_to_ptr.vmem [resolvable:$true] %s26_s15 }
   0x4   :  { %s758_s16 = scalar_lea.vmem %s18_s13, 768  ;;  %p763_p1 = scmp.lt.s32.totalorder %s18_s13, %s18_s13 }
   0x5   :  { %p759_p0 = scmp.ne.s32.totalorder %s18_s13, %s758_s16  ;;  %p764_p2 = scmp.lt.s32.totalorder %s758_s16, %s758_s16 }
   0x7   :  { %p765_p3 = por %p764_p2, %p763_p1 }
   0x9   :  { %p766_p4 = pnand %p765_p3, %p759_p0 }
   0xb   :  { %769 = shalt.err (!%p766_p4)
}
   0xc   :  { %20 = dma.hbm_to_vmem [thread:$0]  %s853_s0, 768, %s18_s13, [#allocation3]  }
   0xd   :  { %s778_s19 = scalar_lea.vmem %s27_s15, 6144  ;;  %p783_p6 = scmp.lt.s32.totalorder %s27_s15, %s27_s15 }
   0xe   :  { %p779_p5 = scmp.ne.s32.totalorder %s27_s15, %s778_s19  ;;  %p784_p7 = scmp.lt.s32.totalorder %s778_s19, %s778_s19 }
  0x10   :  { %p785_p8 = por %p784_p7, %p783_p6 }
  0x12   :  { %p786_p9 = pnand %p785_p8, %p779_p5 }
  0x14   :  { %789 = shalt.err (!%p786_p9)
}
  0x15   :  { %s818_s20 = smov 64   ;;  %s819_s21 = smov 4  }
  0x16   :  { %32 = dma.hbm_to_vmem [thread:$0]  %s854_s1, 6144, %s27_s15, [#allocation6], %s818_s20, %s818_s20, %s819_s21  }
  0x17   :  { %810 = dma.done.wait [#allocation3], 768  }
  0x18   :  { %811 = vsyncadd [#allocation3], 4294966528 }
  0x19   :  { %812 = dma.done.wait [#allocation6], 6144  }
  0x1a   :  { %813 = vsyncadd [#allocation6], 4294961152  ;;  %v702_v0 = vld [vmem:[#allocation5 + $0x78] sm:$0xff]   ;;  %v706_v4 = vld [vmem:[#allocation5 + $0x70] sm:$0xff]   ;;  %s820_s24 = smov [#allocation7]  }
  0x1b   :  { %v703_v1 = vld [vmem:[#allocation5 + $0x38] sm:$0xff]   ;;  %631 = vmatprep.subr.bf16.mxu0 %v702_v0  ;;  %v707_v5 = vld [vmem:[#allocation5 + $0x30] sm:$0xff]   ;;  %v710_v8 = vld [vmem:[#allocation5 + $0x68] sm:$0xff]   ;;  %s572_s25 = sshll.u32 %s820_s24, 4  ;;  %s573_s25 = int_to_ptr.vmem [resolvable:$true] %s572_s25 }
  0x1c   :  { %v704_v2 = vld [vmem:[#allocation5 + $0xf8] sm:$0xff]   ;;  %632 = vmatpush3.bf16.msra.mxu0 %v703_v1  ;;  %v708_v6 = vld [vmem:[#allocation5 + $0xf0] sm:$0xff]   ;;  %v711_v9 = vld [vmem:[#allocation5 + $0x28] sm:$0xff]   ;;  %s790_s26 = scalar_lea.vmem %s573_s25, 128  ;;  %p795_p11 = scmp.lt.s32.totalorder %s573_s25, %s573_s25 }
  0x1d   :  { %v705_v3 = vld [vmem:[#allocation5 + $0xb8] sm:$0xff]   ;;  %653 = vmatprep.subr.bf16.mxu1 %v704_v2  ;;  %633 = vmatprep.subr.bf16.mxu0 %v706_v4  ;;  %v709_v7 = vld [vmem:[#allocation5 + $0xb0] sm:$0xff]   ;;  %v712_v10 = vld [vmem:[#allocation5 + $0xe8] sm:$0xff]   ;;  %p791_p10 = scmp.ne.s32.totalorder %s573_s25, %s790_s26  ;;  %p796_p12 = scmp.lt.s32.totalorder %s790_s26, %s790_s26 }
  0x1e   :  { %654 = vmatpush3.bf16.msra.mxu1 %v705_v3  ;;  %v713_v11 = vld [vmem:[#allocation5 + $0xa8] sm:$0xff]   ;;  %v714_v12 = vld [vmem:[#allocation5 + $0x60] sm:$0xff]   ;;  %v718_v16 = vld [vmem:[#allocation5 + $0x58] sm:$0xff]  }
  0x1f   :  { %655 = vmatprep.subr.bf16.mxu1 %v708_v6  ;;  %v715_v13 = vld [vmem:[#allocation5 + $0x20] sm:$0xff]   ;;  %v719_v17 = vld [vmem:[#allocation5 + $0x18] sm:$0xff]   ;;  %v722_v20 = vld [vmem:[#allocation5 + $0x50] sm:$0xff]   ;;  %p797_p13 = por %p796_p12, %p795_p11 }
  0x20   :  { %634 = vmatpush3.bf16.msra.mxu0 %v707_v5  ;;  %v716_v14 = vld [vmem:[#allocation5 + $0xe0] sm:$0xff]   ;;  %v720_v18 = vld [vmem:[#allocation5 + $0xd8] sm:$0xff]   ;;  %v723_v21 = vld [vmem:[#allocation5 + $0x10] sm:$0xff]  }
  0x21   :  { %635 = vmatprep.subr.bf16.mxu0 %v710_v8  ;;  %v717_v15 = vld [vmem:[#allocation5 + $0xa0] sm:$0xff]   ;;  %v721_v19 = vld [vmem:[#allocation5 + $0x98] sm:$0xff]   ;;  %v724_v22 = vld [vmem:[#allocation5 + $0xd0] sm:$0xff]   ;;  %p798_p0 = pnand %p797_p13, %p791_p10 }
  0x22   :  { %656 = vmatpush3.bf16.msra.mxu1 %v709_v7  ;;  %v725_v23 = vld [vmem:[#allocation5 + $0x90] sm:$0xff]   ;;  %v726_v24 = vld [vmem:[#allocation5 + $0x48] sm:$0xff]   ;;  %v730_v28 = vld [vmem:[#allocation5 + $0x40] sm:$0xff]  }
  0x23   :  { %657 = vmatprep.subr.bf16.mxu1 %v712_v10  ;;  %v727_v25 = vld [vmem:[#allocation5 + $0x8] sm:$0xff]   ;;  %v731_v29 = vld [vmem:[#allocation5] sm:$0xff]   ;;  %v43_v31 = vld [vmem:[#allocation2 + $0x8] sm:$0xff] }
  0x24   :  { %636 = vmatpush3.bf16.msra.mxu0 %v711_v9  ;;  %v728_v26 = vld [vmem:[#allocation5 + $0xc8] sm:$0xff]   ;;  %v732_v30 = vld [vmem:[#allocation5 + $0xc0] sm:$0xff]   ;;  %v49_v32 = vpack.c.bf16 %v43_v31, %v43_v31  ;;  %v42_v34 = vld [vmem:[#allocation2] sm:$0xff] }
  0x25   :  { %637 = vmatprep.subr.bf16.mxu0 %v714_v12  ;;  %v729_v27 = vld [vmem:[#allocation5 + $0x88] sm:$0xff]   ;;  %v733_v33 = vld [vmem:[#allocation5 + $0x80] sm:$0xff]   ;;  %v48_v35 = vpack.c.bf16 %v42_v34, %v42_v34  ;;  %v734_v36 = vld [vmem:[#allocation5 + $0x178] sm:$0xff]  }
  0x26   :  { %658 = vmatpush3.bf16.msra.mxu1 %v713_v11  ;;  %v45_v37 = vld [vmem:[#allocation2 + $0x18] sm:$0xff]  ;;  %477 = vmatprep.mubr.bf16.mxu0 %v49_v32  ;;  %v735_v39 = vld [vmem:[#allocation5 + $0x138] sm:$0xff]   ;;  %v44_v40 = vld [vmem:[#allocation2 + $0x10] sm:$0xff] }
  0x27   :  { %659 = vmatprep.subr.bf16.mxu1 %v716_v14  ;;  %v51_v38 = vpack.c.bf16 %v45_v37, %v45_v37  ;;  %v50_v41 = vpack.c.bf16 %v44_v40, %v44_v40  ;;  %v736_v42 = vld [vmem:[#allocation5 + $0x170] sm:$0xff]   ;;  %v738_v44 = vld [vmem:[#allocation5 + $0x168] sm:$0xff]   ;;  %v740_v46 = vld [vmem:[#allocation5 + $0x160] sm:$0xff]  }
  0x28   :  { %638 = vmatpush3.bf16.msra.mxu0 %v715_v13  ;;  %v737_v43 = vld [vmem:[#allocation5 + $0x130] sm:$0xff]   ;;  %v739_v45 = vld [vmem:[#allocation5 + $0x128] sm:$0xff]   ;;  %v741_v47 = vld [vmem:[#allocation5 + $0x120] sm:$0xff]  }
  0x29   :  { %639 = vmatprep.subr.bf16.mxu0 %v718_v16  ;;  %517 = vmatprep.mubr.bf16.mxu1 %v51_v38  ;;  %v742_v48 = vld [vmem:[#allocation5 + $0x158] sm:$0xff]   ;;  %v744_v50 = vld [vmem:[#allocation5 + $0x150] sm:$0xff]   ;;  %v746_v54 = vld [vmem:[#allocation5 + $0x148] sm:$0xff]  }
  0x2a   :  { %660 = vmatpush3.bf16.msra.mxu1 %v717_v15  ;;  %v743_v49 = vld [vmem:[#allocation5 + $0x118] sm:$0xff]   ;;  %v745_v53 = vld [vmem:[#allocation5 + $0x110] sm:$0xff]   ;;  %v747_v55 = vld [vmem:[#allocation5 + $0x108] sm:$0xff]  }
  0x2b   :  { %661 = vmatprep.subr.bf16.mxu1 %v720_v18  ;;  %v47_v51 = vld [vmem:[#allocation2 + $0x28] sm:$0xff]  ;;  %v748_v56 = vld [vmem:[#allocation5 + $0x140] sm:$0xff]   ;;  %v46_v58 = vld [vmem:[#allocation2 + $0x20] sm:$0xff] }
  0x2c   :  { %640 = vmatpush3.bf16.msra.mxu0 %v719_v17  ;;  %v53_v52 = vpack.c.bf16 %v47_v51, %v47_v51  ;;  %v749_v57 = vld [vmem:[#allocation5 + $0x100] sm:$0xff]   ;;  %v52_v59 = vpack.c.bf16 %v46_v58, %v46_v58  ;;  %v582_v5 = vld [vmem:[%s855_s2] ss:$0 sm:$0xff] }
  0x2d   :  { %641 = vmatprep.subr.bf16.mxu0 %v722_v20 }
  0x2e   :  { %662 = vmatpush3.bf16.msra.mxu1 %v721_v19 }
  0x2f   :  { %663 = vmatprep.subr.bf16.mxu1 %v724_v22 }
  0x30   :  { %642 = vmatpush3.bf16.msra.mxu0 %v723_v21 }
  0x31   :  { %643 = vmatprep.subr.bf16.mxu0 %v726_v24 }
  0x32   :  { %664 = vmatpush3.bf16.msra.mxu1 %v725_v23 }
  0x33   :  { %665 = vmatprep.subr.bf16.mxu1 %v728_v26 }
  0x34   :  { %644 = vmatpush3.bf16.msra.mxu0 %v727_v25 }
  0x35   :  { %645 = vmatprep.subr.bf16.mxu0 %v730_v28 }
  0x36   :  { %666 = vmatpush3.bf16.msra.mxu1 %v729_v27 }
  0x37   :  { %667 = vmatprep.subr.bf16.mxu1 %v732_v30 }
  0x38   :  { %646 = vmatpush3.bf16.msra.mxu0 %v731_v29 }
  0x39   :  { %675 = vmatprep.subr.bf16.mxu0 %v734_v36 }
  0x3a   :  { %668 = vmatpush3.bf16.msra.mxu1 %v733_v33 }
  0x3b   :  { %478 = vmatmul.mubr.bf16.vlgmr.msra.gmra.mxu0 %v48_v35 }
  0x3c   :  { %676 = vmatpush3.bf16.msra.mxu0 %v735_v39  ;;  %557 = vmatprep.mubr.bf16.mxu0 %v53_v52 }
  0x3d   :  { %518 = vmatmul.mubr.bf16.vlgmr.msra.gmra.mxu1 %v50_v41  ;;  %677 = vmatprep.subr.bf16.mxu0 %v736_v42 }
  0x40   :  { %678 = vmatpush3.bf16.msra.mxu0 %v737_v43 }
  0x41   :  { %679 = vmatprep.subr.bf16.mxu0 %v738_v44 }
  0x44   :  { %680 = vmatpush3.bf16.msra.mxu0 %v739_v45 }
  0x45   :  { %681 = vmatprep.subr.bf16.mxu0 %v740_v46 }
  0x48   :  { %682 = vmatpush3.bf16.msra.mxu0 %v741_v47 }
  0x49   :  { %683 = vmatprep.subr.bf16.mxu0 %v742_v48 }
  0x4c   :  { %684 = vmatpush3.bf16.msra.mxu0 %v743_v49 }
  0x4d   :  { %685 = vmatprep.subr.bf16.mxu0 %v744_v50 }
  0x50   :  { %686 = vmatpush3.bf16.msra.mxu0 %v745_v53 }
  0x51   :  { %687 = vmatprep.subr.bf16.mxu0 %v746_v54 }
  0x54   :  { %688 = vmatpush3.bf16.msra.mxu0 %v747_v55 }
  0x55   :  { %689 = vmatprep.subr.bf16.mxu0 %v748_v56 }
  0x58   :  { %690 = vmatpush3.bf16.msra.mxu0 %v749_v57 }
  0x5b   :  { %558 = vmatmul.mubr.bf16.vlgmr.msra.gmra.mxu0 %v52_v59 }
  0xfb   :  { %v647_v60 = vpop.f32.mrf.mxu0 }
  0xfd   :  { %v648_v61 = vpop.f32.mrf.mxu0  ;;  %v669_v62 = vpop.f32.mrf.mxu1 }
  0xfe   :  { %v649_v4 = vadd.f32 %v648_v61, %v647_v60 }
  0xff   :  { %v650_v63 = vpop.f32.mrf.mxu0  ;;  %v670_v0 = vpop.f32.mrf.mxu1 }
 0x100   :  { %v480_v6 = vadd.f32 %v649_v4, %v582_v5  ;;  %v671_v7 = vadd.f32 %v670_v0, %v669_v62 }
 0x101   :  { %v651_v1 = vpop.f32.mrf.mxu0  ;;  %v672_v2 = vpop.f32.mrf.mxu1 }
 0x102   :  { %v520_v10 = vadd.f32 %v671_v7, %v480_v6 }
 0x103   :  { %v673_v3 = vpop.f32.mrf.mxu1 }
 0x11b   :  { %v691_v8 = vpop.f32.mrf.mxu0 }
 0x11d   :  { %v692_v9 = vpop.f32.mrf.mxu0 }
 0x11e   :  { %v693_v11 = vadd.f32 %v692_v9, %v691_v8 }
 0x11f   :  { %v694_v12 = vpop.f32.mrf.mxu0 }
 0x120   :  { %v560_v13 = vadd.f32 %v693_v11, %v520_v10 }
 0x121   :  { %v695_v14 = vpop.f32.mrf.mxu0 }
 0x122   :  { %565 = vst [vmem:[#allocation7] sm:$0xff] %v560_v13 }
 0x123   :  { %801 = shalt.err (!%p798_p0)
}
 0x124   :  { %575 = dma.vmem_to_hbm [thread:$0]  %s573_s25, 128, %s856_s3, [#allocation4]  }
 0x125   :  { %814 = dma.done.wait [#allocation4], 128  }
 0x126   :  { %815 = vsyncadd [#allocation4], 4294967168 }
 0x127   :  { %579 = vsyncpa [#allocation3], 1 }
 0x128   :  { %580 = vsyncpa [#allocation6], 1 }
 0x129   :  { %581 = vsyncpa [#allocation4], 1 }

</bundles_post_ra>
